<compile_context>
chip_gen: v5e
topology: v5e:2x2
jax: 0.10.0
libtpu: 0.0.40
codegen_flags: <defaults>
</compile_context>

<pallas_src>
import numpy as np
import jax
import jax.numpy as jnp
from jax.experimental import pallas as pl
from jax.experimental.pallas import tpu as pltpu


def _round_up(x: int, m: int) -> int:
    return ((x + m - 1) // m) * m


def _side_fm_kernel(ids_ref, dense_ref, off_ref, rhs_ref, v1_ref, v2_ref):
    """One batch tile: a single fused block-diagonal MXU pass produces v2 and v1.

    ids_ref   : [TILE_N, S]     int32  raw per-field ids (offsets NOT yet added)
    dense_ref : [TILE_N, D]     f32
    off_ref   : [1, S]          int32  per-field vocab offsets
    rhs_ref   : [V + D, F + 1]  f32    block-diagonal fused table, F = (S+D)*E
                  rows 0..V-1   : so_emb[v] in its field's E-lane slot, lin_emb[v] in column F
                  rows V..V+D-1 : so_w[d]  in its dense  E-lane slot, lin_w[d]  in column F
    v1_ref    : [TILE_N, 1]     f32
    v2_ref    : [TILE_N, F]     f32    flattened, lane-dense second-order vectors
    """
    tile_n, S = ids_ref.shape
    D = dense_ref.shape[1]
    K, F1 = rhs_ref.shape
    F = F1 - 1
    V = K - D

    # Offsets fused in-kernel (free VPU work under the matmul).
    ids = ids_ref[...] + off_ref[...]                        # [TILE_N, S] int32
    dense = dense_ref[...]                                   # [TILE_N, D] f32

    # Fused LHS over K = V + D lanes:
    #   lanes 0..V-1   : multi-hot of the S offset ids (per-field vocab ranges are disjoint,
    #                    so summing per-field one-hots never collides),
    #   lanes V..V+D-1 : the raw dense feature values.
    # NOTE: an out-of-range id (id + offset outside [0, V)) silently contributes nothing instead
    # of the framework's out-of-range behavior; inputs are assumed valid, as in the PyTorch module.
    lane_iota = jax.lax.broadcasted_iota(jnp.int32, (tile_n, K), 1)
    lhs = jnp.zeros((tile_n, K), jnp.float32)
    for f in range(S):                                       # S is small & static -> unrolled VPU
        lhs = lhs + (lane_iota == ids[:, f:f + 1]).astype(jnp.float32)
    for d in range(D):                                       # D is small & static -> unrolled VPU
        lhs = lhs + jnp.where(lane_iota == V + d, dense[:, d:d + 1], 0.0)

    # ONE MXU pass per tile (K <= 128, F+1 <= 128 at module-scale shapes): columns 0..F-1 are the
    # flattened per-field second-order vectors, column F is the fused first-order (linear) term.
    out = jnp.dot(lhs, rhs_ref[...], preferred_element_type=jnp.float32)   # [TILE_N, F+1]

    # Two stores per tile (previously S+D+1 narrow masked stores).
    v2_ref[...] = out[:, :F]
    v1_ref[...] = out[:, F:F + 1]


def _pick_tile_n(n: int, tile_n_max: int) -> int:
    """Adaptive batch tile: minimal padding for small batches; >=2 grid steps (v7x has 2 TCs and
    "parallel" only shards with >=2 steps) and 128-row-aligned MXU M for large batches; capped by
    tile_n_max so double-buffered VMEM stays small on every generation."""
    if n <= 256:
        return _round_up(max(n, 1), 8)
    steps = max(2, pl.cdiv(n, tile_n_max))
    return max(128, min(tile_n_max, _round_up(pl.cdiv(n, steps), 128)))


def _vmem_limit_bytes(tile_n: int, s: int, d: int, f: int, k: int) -> int:
    """Actual lane-padded, double-buffered footprint x2 headroom, clamped to [8, 32] MiB
    (well under the 64 MiB physical VMEM per TC on v7x, 128 MiB on v5e/v6e)."""
    lane = lambda c: _round_up(c, 128)
    per_step = tile_n * 4 * (lane(s) + lane(d) + lane(f) + lane(1))   # ids + dense + v2 + v1 blocks
    tables = _round_up(k, 8) * lane(f + 1) * 4 + 8 * lane(s) * 4      # fused RHS + offsets blocks
    scratch = tile_n * 4 * (lane(k) + lane(f + 1))                    # fused LHS + matmul result
    est = 2 * (per_step + tables) + scratch                           # double-buffered pipeline
    return int(min(max(2 * est, 8 * 1024 * 1024), 32 * 1024 * 1024))


def side_fm_forward(sparse_x, dense_x, params, offsets, tile_n_max: int = 1024):
    """Pallas forward for SideFMVectorBaseModule.

    sparse_x: [N, S] int32 raw per-field feature ids
    dense_x : [N, D] float dense features
    returns (v1 [N] f32, v2 [N, S+D, E] f32)
    """
    N, S = sparse_x.shape
    D = dense_x.shape[1]
    V, E = params["so_emb"].shape
    F = (S + D) * E
    K = V + D

    # ---- One-time (tiny) wrapper-side fusion: block-diagonal RHS [V+D, F+1]. ----
    # Field membership of each vocab row (offsets are ascending and start at 0).
    vocab = jnp.arange(V, dtype=jnp.int32)
    off_i32 = offsets.astype(jnp.int32)
    field_of_row = (vocab[:, None] >= off_i32[None, :]).astype(jnp.int32).sum(axis=1) - 1   # [V]
    field_onehot = (field_of_row[:, None] ==
                    jnp.arange(S, dtype=jnp.int32)[None, :]).astype(jnp.float32)            # [V, S]
    so_emb = params["so_emb"].astype(jnp.float32)
    so_w = params["so_w"].astype(jnp.float32)
    rhs_sparse = jnp.concatenate(
        [(field_onehot[:, :, None] * so_emb[:, None, :]).reshape(V, S * E),
         jnp.zeros((V, D * E), jnp.float32),
         params["lin_emb"].astype(jnp.float32)], axis=1)                                    # [V, F+1]
    rhs_dense = jnp.concatenate(
        [jnp.zeros((D, S * E), jnp.float32),
         (jnp.eye(D, dtype=jnp.float32)[:, :, None] * so_w[:, None, :]).reshape(D, D * E),
         params["lin_w"].astype(jnp.float32)], axis=1)                                      # [D, F+1]
    rhs = jnp.concatenate([rhs_sparse, rhs_dense], axis=0)                                  # [K, F+1]
    # (bf16 fused table + multi-hot would halve MXU passes but break the 1e-5 f32 tolerance.)

    tile_n = _pick_tile_n(N, tile_n_max)
    n_pad = _round_up(N, tile_n)

    ids = sparse_x.astype(jnp.int32)
    dense = dense_x.astype(jnp.float32)
    if n_pad != N:
        pad = n_pad - N
        ids = jnp.pad(ids, ((0, pad), (0, 0)))     # id 0 is always valid; rows sliced off below
        dense = jnp.pad(dense, ((0, pad), (0, 0)))
    off2d = off_i32.reshape(1, S)

    grid = (n_pad // tile_n,)

    v1_col, v2_flat = pl.pallas_call(
        _side_fm_kernel,
        grid=grid,
        in_specs=[
            pl.BlockSpec((tile_n, S), lambda i: (i, 0)),       # ids tile
            pl.BlockSpec((tile_n, D), lambda i: (i, 0)),       # dense tile
            pl.BlockSpec((1, S), lambda i: (0, 0)),            # offsets (constant block)
            pl.BlockSpec((K, F + 1), lambda i: (0, 0)),        # fused block-diagonal table
        ],
        out_specs=(
            pl.BlockSpec((tile_n, 1), lambda i: (i, 0)),       # v1 column
            pl.BlockSpec((tile_n, F), lambda i: (i, 0)),       # flattened lane-dense v2
        ),
        out_shape=(
            jax.ShapeDtypeStruct((n_pad, 1), jnp.float32),
            jax.ShapeDtypeStruct((n_pad, F), jnp.float32),
        ),
        compiler_params=pltpu.CompilerParams(
            dimension_semantics=("parallel",),                 # shard batch across TCs on v7x
            vmem_limit_bytes=_vmem_limit_bytes(tile_n, S, D, F, K),
        ),
    )(ids, dense, off2d, rhs)

    v1 = v1_col[:N, 0]
    v2 = v2_flat[:N].reshape(N, S + D, E)                      # free layout plumbing
    return v1, v2


def ref_forward(sparse_x, dense_x, params, offsets):
    """Pure-JAX reference (mirrors the PyTorch module)."""
    ids = sparse_x + offsets[None, :]
    v1 = params["lin_emb"][ids, 0].sum(axis=1) + (dense_x * params["lin_w"][:, 0]).sum(axis=1)
    v2_sparse = params["so_emb"][ids]                          # [N, S, E]
    v2_dense = dense_x[:, :, None] * params["so_w"][None]      # [N, D, E]
    v2 = jnp.concatenate([v2_sparse, v2_dense], axis=1)
    return v1, v2


if __name__ == "__main__":
    # Small, module-consistent shapes (also exercises the batch-pad / unpad path: N=6 -> 8).
    sparse_field_nums = (8, 8, 16)            # per-field vocab sizes, V = 32
    S = len(sparse_field_nums)
    D = 4                                     # dense_num_field
    E = 8                                     # embed_dim
    N = 6                                     # batch
    V = int(sum(sparse_field_nums))

    offsets = jnp.asarray(
        np.asarray((0, *np.cumsum(sparse_field_nums)[:-1]), dtype=np.int32))

    key = jax.random.PRNGKey(0)
    k1, k2, k3, k4, k5, k6 = jax.random.split(key, 6)

    # Parameters (~ N(0, 1), matching nn.Embedding / nn.init.normal_ defaults).
    params = {
        "lin_emb": jax.random.normal(k1, (V, 1), dtype=jnp.float32),   # sparse_linear table
        "lin_w":   jax.random.normal(k2, (D, 1), dtype=jnp.float32),   # dense_linear weight
        "so_emb":  jax.random.normal(k3, (V, E), dtype=jnp.float32),   # sparse_second_order table
        "so_w":    jax.random.normal(k4, (D, E), dtype=jnp.float32),   # dense_second_order weight
    }

    # Inputs: per-field sparse ids in [0, field_num), dense floats.
    field_sizes = jnp.asarray(sparse_field_nums, dtype=jnp.int32)
    sparse_x = (jax.random.randint(k5, (N, S), 0, 10_000) % field_sizes[None, :]).astype(jnp.int32)
    dense_x = jax.random.normal(k6, (N, D), dtype=jnp.float32)

    v1, v2 = side_fm_forward(sparse_x, dense_x, params, offsets)
    jax.block_until_ready((v1, v2))

    v1_ref, v2_ref = ref_forward(sparse_x, dense_x, params, offsets)
    np.testing.assert_allclose(np.asarray(v1), np.asarray(v1_ref), rtol=1e-5, atol=1e-5)
    np.testing.assert_allclose(np.asarray(v2), np.asarray(v2_ref), rtol=1e-5, atol=1e-5)
    assert v1.shape == (N,) and v2.shape == (N, S + D, E)

    print("KERNEL_OK")
</pallas_src>

<mosaic_0001>
module attributes {stable_mosaic.version = 11 : i64} {
  func.func @_side_fm_kernel(%arg0: i32, %arg1: memref<8x3xi32, #tpu.memory_space<vmem>>, %arg2: memref<8x4xf32, #tpu.memory_space<vmem>>, %arg3: memref<1x3xi32, #tpu.memory_space<vmem>>, %arg4: memref<36x57xf32, #tpu.memory_space<vmem>>, %arg5: memref<8x1xf32, #tpu.memory_space<vmem>>, %arg6: memref<8x56xf32, #tpu.memory_space<vmem>>) attributes {dimension_semantics = [#tpu.dimension_semantics<parallel>], iteration_bounds = array<i64: 1>, scalar_prefetch = 0 : i64, scratch_operands = 0 : i64, tpu.core_type = #tpu.core_type<tc>, window_params = [{transform_indices = @transform_0, window_bounds = array<i64: 8, 3>}, {transform_indices = @transform_1, window_bounds = array<i64: 8, 4>}, {pipeline_mode = #tpu.pipeline_mode<synchronous>, transform_indices = @transform_2, window_bounds = array<i64: 1, 3>}, {pipeline_mode = #tpu.pipeline_mode<synchronous>, transform_indices = @transform_3, window_bounds = array<i64: 36, 57>}, {transform_indices = @transform_4, window_bounds = array<i64: 8, 1>}, {transform_indices = @transform_5, window_bounds = array<i64: 8, 56>}]} {
    %c0 = arith.constant 0 : index
    %c0_0 = arith.constant 0 : index
    %0 = vector.load %arg1[%c0, %c0_0] : memref<8x3xi32, #tpu.memory_space<vmem>>, vector<8x3xi32>
    %c0_1 = arith.constant 0 : index
    %c0_2 = arith.constant 0 : index
    %1 = vector.load %arg3[%c0_1, %c0_2] : memref<1x3xi32, #tpu.memory_space<vmem>>, vector<1x3xi32>
    %2 = vector.broadcast %1 : vector<1x3xi32> to vector<8x3xi32>
    %3 = arith.addi %0, %2 : vector<8x3xi32>
    %c0_3 = arith.constant 0 : index
    %c0_4 = arith.constant 0 : index
    %4 = vector.load %arg2[%c0_3, %c0_4] : memref<8x4xf32, #tpu.memory_space<vmem>>, vector<8x4xf32>
    %5 = tpu.iota {dimensions = array<i32: 1>} : vector<8x36xi32>
    %cst = arith.constant 0.000000e+00 : f32
    %6 = vector.broadcast %cst : f32 to vector<8x36xf32>
    %7 = vector.extract_strided_slice %3 {offsets = [0, 0], sizes = [8, 1], strides = [1, 1]} : vector<8x3xi32> to vector<8x1xi32>
    %8 = vector.broadcast %7 : vector<8x1xi32> to vector<8x36xi32>
    %9 = arith.cmpi eq, %5, %8 : vector<8x36xi32>
    %10 = arith.extui %9 : vector<8x36xi1> to vector<8x36xi32>
    %11 = arith.sitofp %10 : vector<8x36xi32> to vector<8x36xf32>
    %12 = arith.addf %6, %11 : vector<8x36xf32>
    %13 = vector.extract_strided_slice %3 {offsets = [0, 1], sizes = [8, 1], strides = [1, 1]} : vector<8x3xi32> to vector<8x1xi32>
    %14 = vector.broadcast %13 : vector<8x1xi32> to vector<8x36xi32>
    %15 = arith.cmpi eq, %5, %14 : vector<8x36xi32>
    %16 = arith.extui %15 : vector<8x36xi1> to vector<8x36xi32>
    %17 = arith.sitofp %16 : vector<8x36xi32> to vector<8x36xf32>
    %18 = arith.addf %12, %17 : vector<8x36xf32>
    %19 = vector.extract_strided_slice %3 {offsets = [0, 2], sizes = [8, 1], strides = [1, 1]} : vector<8x3xi32> to vector<8x1xi32>
    %20 = vector.broadcast %19 : vector<8x1xi32> to vector<8x36xi32>
    %21 = arith.cmpi eq, %5, %20 : vector<8x36xi32>
    %22 = arith.extui %21 : vector<8x36xi1> to vector<8x36xi32>
    %23 = arith.sitofp %22 : vector<8x36xi32> to vector<8x36xf32>
    %24 = arith.addf %18, %23 : vector<8x36xf32>
    %c32_i32 = arith.constant 32 : i32
    %25 = vector.broadcast %c32_i32 : i32 to vector<8x36xi32>
    %26 = arith.cmpi eq, %5, %25 : vector<8x36xi32>
    %27 = vector.extract_strided_slice %4 {offsets = [0, 0], sizes = [8, 1], strides = [1, 1]} : vector<8x4xf32> to vector<8x1xf32>
    %cst_5 = arith.constant 0.000000e+00 : f32
    %28 = vector.shape_cast %27 : vector<8x1xf32> to vector<8x1xf32>
    %29 = vector.broadcast %28 : vector<8x1xf32> to vector<8x36xf32>
    %30 = vector.broadcast %cst_5 : f32 to vector<8x36xf32>
    %31 = arith.select %26, %29, %30 : vector<8x36xi1>, vector<8x36xf32>
    %32 = arith.addf %24, %31 : vector<8x36xf32>
    %c33_i32 = arith.constant 33 : i32
    %33 = vector.broadcast %c33_i32 : i32 to vector<8x36xi32>
    %34 = arith.cmpi eq, %5, %33 : vector<8x36xi32>
    %35 = vector.extract_strided_slice %4 {offsets = [0, 1], sizes = [8, 1], strides = [1, 1]} : vector<8x4xf32> to vector<8x1xf32>
    %cst_6 = arith.constant 0.000000e+00 : f32
    %36 = vector.shape_cast %35 : vector<8x1xf32> to vector<8x1xf32>
    %37 = vector.broadcast %36 : vector<8x1xf32> to vector<8x36xf32>
    %38 = vector.broadcast %cst_6 : f32 to vector<8x36xf32>
    %39 = arith.select %34, %37, %38 : vector<8x36xi1>, vector<8x36xf32>
    %40 = arith.addf %32, %39 : vector<8x36xf32>
    %c34_i32 = arith.constant 34 : i32
    %41 = vector.broadcast %c34_i32 : i32 to vector<8x36xi32>
    %42 = arith.cmpi eq, %5, %41 : vector<8x36xi32>
    %43 = vector.extract_strided_slice %4 {offsets = [0, 2], sizes = [8, 1], strides = [1, 1]} : vector<8x4xf32> to vector<8x1xf32>
    %cst_7 = arith.constant 0.000000e+00 : f32
    %44 = vector.shape_cast %43 : vector<8x1xf32> to vector<8x1xf32>
    %45 = vector.broadcast %44 : vector<8x1xf32> to vector<8x36xf32>
    %46 = vector.broadcast %cst_7 : f32 to vector<8x36xf32>
    %47 = arith.select %42, %45, %46 : vector<8x36xi1>, vector<8x36xf32>
    %48 = arith.addf %40, %47 : vector<8x36xf32>
    %c35_i32 = arith.constant 35 : i32
    %49 = vector.broadcast %c35_i32 : i32 to vector<8x36xi32>
    %50 = arith.cmpi eq, %5, %49 : vector<8x36xi32>
    %51 = vector.extract_strided_slice %4 {offsets = [0, 3], sizes = [8, 1], strides = [1, 1]} : vector<8x4xf32> to vector<8x1xf32>
    %cst_8 = arith.constant 0.000000e+00 : f32
    %52 = vector.shape_cast %51 : vector<8x1xf32> to vector<8x1xf32>
    %53 = vector.broadcast %52 : vector<8x1xf32> to vector<8x36xf32>
    %54 = vector.broadcast %cst_8 : f32 to vector<8x36xf32>
    %55 = arith.select %50, %53, %54 : vector<8x36xi1>, vector<8x36xf32>
    %56 = arith.addf %48, %55 : vector<8x36xf32>
    %c0_9 = arith.constant 0 : index
    %c0_10 = arith.constant 0 : index
    %57 = vector.load %arg4[%c0_9, %c0_10] : memref<36x57xf32, #tpu.memory_space<vmem>>, vector<36x57xf32>
    %cst_11 = arith.constant dense<0.000000e+00> : vector<8x57xf32>
    %58 = tpu.matmul %56, %57, %cst_11 {dimension_numbers = #tpu.dot_dimension_numbers<[1], [0], [0], [1], [0, 0, 1, 1], [], []>} : vector<8x36xf32>, vector<36x57xf32>, vector<8x57xf32> -> vector<8x57xf32>
    %59 = vector.extract_strided_slice %58 {offsets = [0, 0], sizes = [8, 56], strides = [1, 1]} : vector<8x57xf32> to vector<8x56xf32>
    %c0_12 = arith.constant 0 : index
    %c0_13 = arith.constant 0 : index
    %60 = vector.load %arg6[%c0_12, %c0_13] : memref<8x56xf32, #tpu.memory_space<vmem>>, vector<8x56xf32>
    tpu.vector_store %arg6[%c0_12, %c0_13], %59 {strides = array<i32>} : memref<8x56xf32, #tpu.memory_space<vmem>>, vector<8x56xf32>,
    %61 = vector.extract_strided_slice %58 {offsets = [0, 56], sizes = [8, 1], strides = [1, 1]} : vector<8x57xf32> to vector<8x1xf32>
    %c0_14 = arith.constant 0 : index
    %c0_15 = arith.constant 0 : index
    %62 = vector.load %arg5[%c0_14, %c0_15] : memref<8x1xf32, #tpu.memory_space<vmem>>, vector<8x1xf32>
    tpu.vector_store %arg5[%c0_14, %c0_15], %61 {strides = array<i32>} : memref<8x1xf32, #tpu.memory_space<vmem>>, vector<8x1xf32>,
    return
  }
  func.func @transform_0(%arg0: i32) -> (i32, i32) {
    %c0_i32 = arith.constant 0 : i32
    %c0_i32_0 = arith.constant 0 : i32
    return %arg0, %c0_i32 : i32, i32
  }
  func.func @transform_1(%arg0: i32) -> (i32, i32) {
    %c0_i32 = arith.constant 0 : i32
    %c0_i32_0 = arith.constant 0 : i32
    return %arg0, %c0_i32 : i32, i32
  }
  func.func @transform_2(%arg0: i32) -> (i32, i32) {
    %c0_i32 = arith.constant 0 : i32
    %c0_i32_0 = arith.constant 0 : i32
    %c0_i32_1 = arith.constant 0 : i32
    return %c0_i32, %c0_i32_0 : i32, i32
  }
  func.func @transform_3(%arg0: i32) -> (i32, i32) {
    %c0_i32 = arith.constant 0 : i32
    %c0_i32_0 = arith.constant 0 : i32
    %c0_i32_1 = arith.constant 0 : i32
    return %c0_i32, %c0_i32_0 : i32, i32
  }
  func.func @transform_4(%arg0: i32) -> (i32, i32) {
    %c0_i32 = arith.constant 0 : i32
    %c0_i32_0 = arith.constant 0 : i32
    return %arg0, %c0_i32 : i32, i32
  }
  func.func @transform_5(%arg0: i32) -> (i32, i32) {
    %c0_i32 = arith.constant 0 : i32
    %c0_i32_0 = arith.constant 0 : i32
    return %arg0, %c0_i32 : i32, i32
  }
}

</mosaic_0001>

<bundles_post_ra>
// kernel: tpu_custom_call.1
= control target key start
LH: loop header
LB: loop body
LE: loop exit
PB: predicated region body
PF: predicated region fallthrough
CT: control target
= control target key end

     0   :  { %11 = vsyncpa [#allocation3], 0  ;;  %s289_s0 = inlined_call_operand.vmem [shape: s32[8,3], index: 0, kind: input, shape index: {}]   ;;  %s290_s1 = inlined_call_operand.vmem [shape: f32[8,4], index: 1, kind: input, shape index: {}]   ;;  %s291_s2 = inlined_call_operand.vmem [shape: s32[1,3], index: 2, kind: input, shape index: {}]   ;;  %s292_s3 = inlined_call_operand.hbm [shape: f32[36,57], index: 3, kind: input, shape index: {}]   ;;  %s293_s4 = inlined_call_operand.vmem [shape: f32[8,1], index: 4, kind: output, shape index: {0}]   ;;  %s294_s5 = inlined_call_operand.hbm [shape: f32[8,56], index: 5, kind: output, shape index: {1}]  }
   0x1   :  { %12 = vsyncpa [#allocation4], 0  ;;  %s23_s20 = sshll.u32 %s292_s3, 4  ;;  %s231_s21 = smov [#allocation2]   ;;  %s24_s20 = int_to_ptr.hbm [resolvable:$true] %s23_s20 }
   0x2   :  { %s25_s22 = sshll.u32 %s231_s21, 4  ;;  %s232_s23 = smov 128   ;;  %s26_s22 = int_to_ptr.vmem [resolvable:$true] %s25_s22 }
   0x3   :  { %s233_s24 = smov 8  }
   0x4   :  { %31 = dma.hbm_to_vmem [thread:$0]  %s24_s20, 640, %s26_s22, [#allocation3], %s232_s23, %s232_s23, %s233_s24  }
   0x5   :  { %227 = dma.done.wait [#allocation3], 640  }
   0x6   :  { %228 = vsyncadd [#allocation3], 4294966656  ;;  %v234_v0 = vmov 0   ;;  %v235_v1 = vmov 2   ;;  %v236_v2 = vmov 1   ;;  %v36_v3 = vld [vmem:[%s289_s0] sm:$0xff]  ;;  %v41_v13 = vlaneseq }
   0x7   :  { %170 = vset.pattern.permute.xlu0 %v234_v0  ;;  %172 = vset.pattern.permute.xlu1 %v235_v1  ;;  %v178_v4 = vld [vmem:[%s291_s2] ss:$0 sm:$0xff]  ;;  %v237_v7 = vmov 3   ;;  %vm102_vm0 = vcmask 1043456   ;;  %v96_v9 = vld [vmem:[#allocation2 + $0x18] sm:$0xff]  ;;  %v95_v10 = vld [vmem:[#allocation2 + $0x10] sm:$0xff] }
   0x8   :  { %174 = vset.pattern.permute.xlu2 %v236_v2  ;;  %v40_v5 = vld [vmem:[%s290_s1] sm:$0xff]  ;;  %v39_v6 = vadd.s32 %v178_v4, %v36_v3  ;;  %v94_v11 = vld [vmem:[#allocation2 + $0x8] sm:$0xff]  ;;  %v42_v16 = vand.u32 127, %v41_v13  ;;  %v238_v20 = vmov 0.0   ;;  %vm98_vm8 = vcmask 293888   ;;  %s239_s0 = smov [#allocation5]  }
   0x9   :  { %74 = vperm.xlu2 %174, %v40_v5   ;;  %v97_v8 = vld [vmem:[#allocation2 + $0x20] sm:$0xf]  ;;  %s141_s1 = sshll.u32 %s239_s0, 4  ;;  %s143_s6 = sshll.u32 %s294_s5, 4  ;;  %vm126_vm9 = vcmask 457728   ;;  %vm132_vm10 = vcmask 7168   ;;  %s142_s1 = int_to_ptr.vmem [resolvable:$true] %s141_s1  ;;  %s144_s6 = int_to_ptr.hbm [resolvable:$true] %s143_s6 }
   0xa   :  { %44 = vperm.xlu0 %170, %v39_v6   ;;  %58 = vperm.xlu1 %172, %v39_v6   ;;  %v93_v12 = vld [vmem:[#allocation2] sm:$0xff]  ;;  %vm64_vm4 = vcmp.eq.s32.totalorder %v42_v16, 32  ;;  %vm72_vm5 = vcmp.eq.s32.totalorder %v42_v16, 33  ;;  %vm79_vm6 = vcmp.eq.s32.totalorder %v42_v16, 34  ;;  %vm86_vm7 = vcmp.eq.s32.totalorder %v42_v16, 35  ;;  %s240_s7 = smov 72  }
   0xb   :  { %158 = vmatpush.msk.msra.mxu0 %vm102_vm0, %v97_v8 }
   0xd   :  { %118 = vmatpush.msra.mxu0 %v96_v9 }
   0xf   :  { %119 = vmatpush.msra.mxu0 %v95_v10 }
  0x11   :  { %175 = vset.pattern.permute.xlu2 %v235_v1  ;;  %120 = vmatpush.msra.mxu0 %v94_v11 }
  0x12   :  { %81 = vperm.xlu2 %175, %v40_v5   ;;  %171 = vset.pattern.permute.xlu0 %v236_v2 }
  0x13   :  { %173 = vset.pattern.permute.xlu1 %v234_v0  ;;  %51 = vperm.xlu0 %171, %v39_v6  }
  0x14   :  { %67 = vperm.xlu1 %173, %v40_v5   ;;  %121 = vmatpush.msra.mxu0 %v93_v12 }
  0x1b   :  { %177 = vset.pattern.permute.xlu0 %v237_v7 }
  0x1c   :  { %176 = vset.pattern.permute.xlu1 %v237_v7 }
  0x1d   :  { %88 = vperm.xlu1 %176, %v40_v5  }
  0x63   :  { %v75_v17 = vpop.permute.xlu2 %74 }
  0x64   :  { %v77_v29 = vsel %vm72_vm5, %v75_v17, 0.0 }
  0x6c   :  { %v82_v26 = vpop.permute.xlu2 %81 }
  0x6d   :  { %v84_v30 = vsel %vm79_vm6, %v82_v26, 0.0 }
  0x7c   :  { %v45_v14 = vpop.permute.xlu0 %44  ;;  %v59_v15 = vpop.permute.xlu1 %58 }
  0x7d   :  { %vm46_vm1 = vcmp.eq.s32.totalorder %v42_v16, %v45_v14  ;;  %vm60_vm2 = vcmp.eq.s32.totalorder %v42_v16, %v59_v15 }
  0x7e   :  { %v155_v21 = vsel %vm46_vm1, 1.0, %v238_v20  ;;  %v157_v24 = vsel %vm60_vm2, 1.0, %v238_v20 }
  0x85   :  { %v52_v18 = vpop.permute.xlu0 %51 }
  0x86   :  { %v68_v19 = vpop.permute.xlu1 %67  ;;  %vm53_vm3 = vcmp.eq.s32.totalorder %v42_v16, %v52_v18 }
  0x87   :  { %v156_v22 = vsel %vm53_vm3, 1.0, %v238_v20  ;;  %v70_v27 = vsel %vm64_vm4, %v68_v19, 0.0 }
  0x88   :  { %v56_v23 = vadd.f32 %v156_v22, %v155_v21 }
  0x8a   :  { %v63_v25 = vadd.f32 %v157_v24, %v56_v23 }
  0x8c   :  { %v71_v28 = vadd.f32 %v70_v27, %v63_v25 }
  0x8e   :  { %v78_v31 = vadd.f32 %v77_v29, %v71_v28 }
  0x8f   :  { %v89_v32 = vpop.permute.xlu1 %88 }
  0x90   :  { %v91_v33 = vsel %vm86_vm7, %v89_v32, 0.0  ;;  %v85_v34 = vadd.f32 %v84_v30, %v78_v31 }
  0x92   :  { %v92_v35 = vadd.f32 %v91_v33, %v85_v34 }
  0x94   :  { %159 = vmatmul.msk.f32.vlgmr.msra.gmra.mxu0 %vm98_vm8, %v92_v35 }
 0x111   :  { %v123_v36 = vpop.f32.mrf.mxu0 }
 0x112   :  { %127 = vst.msk [vmem:[#allocation5] sm:$0xff] %vm126_vm9, %v123_v36  ;;  %129 = vrot.lane.b32.xlu2 %v123_v36, %s240_s7 }
 0x113   :  { %146 = dma.vmem_to_hbm [thread:$0]  %s142_s1, 128, %s144_s6, [#allocation4]  }
 0x16c   :  { %v130_v37 = vpop.permute.xlu2 %129 }
 0x16d   :  { %133 = vst.msk [vmem:[%s293_s4] sm:$0xff] %vm132_vm10, %v130_v37 }
 0x16e   :  { %229 = dma.done.wait [#allocation4], 128  }
 0x16f   :  { %230 = vsyncadd [#allocation4], 4294967168 }
 0x170   :  { %153 = vsyncpa [#allocation3], 1 }
 0x171   :  { %154 = vsyncpa [#allocation4], 1 }

</bundles_post_ra>
